<compile_context>
chip_gen: v7x
topology: tpu7x:2x2x1
jax: 0.10.0
libtpu: 0.0.40
codegen_flags: <defaults>
</compile_context>

<pallas_src>
import jax
import jax.numpy as jnp
from jax.experimental import pallas as pl
from jax.experimental.pallas import tpu as pltpu


def feature_extractor_kernel(x_ref, w1_ref, b1_ref, w2_ref, b2_ref,
                             x1_ref, x2_ref):
    """One batch tile per grid step: fused fc1+relu -> fc2+relu."""
    # fc1 + ReLU: native-dtype MXU matmul with f32 accumulation.
    h1 = jnp.dot(x_ref[...], w1_ref[...], preferred_element_type=jnp.float32)
    x1 = jnp.maximum(h1 + b1_ref[...], 0.0).astype(x1_ref.dtype)
    x1_ref[...] = x1

    # fc2 + ReLU, consuming the just-computed x1 straight from vregs/VMEM
    # (no HBM round-trip).  Cast to the weight dtype so operands match.
    h2 = jnp.dot(x1.astype(w2_ref.dtype), w2_ref[...],
                 preferred_element_type=jnp.float32)
    x2_ref[...] = jnp.maximum(h2 + b2_ref[...], 0.0).astype(x2_ref.dtype)


def _round_up(n: int, m: int) -> int:
    return ((n + m - 1) // m) * m


def _pick_b_tile(B: int) -> int:
    """Whole batch in one step when small (per-step overhead dominates);
    otherwise cap rows per step so the pipeline has a steady state."""
    if B <= 512:
        return B
    for cand in (512, 384, 256, 128, 64, 32, 16, 8):
        if B % cand == 0:
            return cand
    return B  # fallback: single step


def feature_extractor(x, w1, b1, w2, b2, *, b_tile=None):
    """x: (B, D); w1: (H1, D); b1: (H1,); w2: (H2, H1); b2: (H2,).

    Returns (x1, x2) with shapes (B, H1), (B, H2) — same as the PyTorch forward.
    """
    B, D = x.shape
    H1, D1 = w1.shape
    H2, H1b = w2.shape
    assert D1 == D and H1b == H1

    # Lane-dense outputs: pad hidden dims to a multiple of 128.
    H1p = _round_up(H1, 128)
    H2p = _round_up(H2, 128)

    # Pre-transpose weights to (in, out) so the contraction is x @ W and the
    # output's last (lane) dim is the hidden size.  Biases become (1, H).
    w1_t = jnp.asarray(w1).T                      # (D, H1)
    w2_t = jnp.asarray(w2).T                      # (H1, H2)
    b1_2d = jnp.asarray(b1).reshape(1, H1)
    b2_2d = jnp.asarray(b2).reshape(1, H2)
    if H1p != H1:
        w1_t = jnp.pad(w1_t, ((0, 0), (0, H1p - H1)))
        b1_2d = jnp.pad(b1_2d, ((0, 0), (0, H1p - H1)))
        w2_t = jnp.pad(w2_t, ((0, H1p - H1), (0, 0)))
    if H2p != H2:
        w2_t = jnp.pad(w2_t, ((0, 0), (0, H2p - H2)))
        b2_2d = jnp.pad(b2_2d, ((0, 0), (0, H2p - H2)))

    if b_tile is None:
        b_tile = _pick_b_tile(B)
    assert B % b_tile == 0
    grid = (B // b_tile,)

    # Advisory cost estimate (helps XLA schedule around a tiny kernel).
    flops = 2 * B * (D * H1p + H1p * H2p)
    bytes_accessed = int(
        x.size * x.dtype.itemsize
        + w1_t.size * w1_t.dtype.itemsize
        + w2_t.size * w2_t.dtype.itemsize
        + b1_2d.size * b1_2d.dtype.itemsize
        + b2_2d.size * b2_2d.dtype.itemsize
        + B * H1p * x.dtype.itemsize
        + B * H2p * x.dtype.itemsize)
    cost = pl.CostEstimate(flops=flops, transcendentals=0,
                           bytes_accessed=bytes_accessed)

    # Explicit VMEM budget: resident weights (<=2 buffers) + double-buffered
    # batch tiles + slack, capped well under v7x's 64 MiB physical VMEM.
    itemsize = jnp.dtype(x.dtype).itemsize
    weight_bytes = int((w1_t.size + w2_t.size + b1_2d.size + b2_2d.size)
                       * w1_t.dtype.itemsize)
    tile_bytes = b_tile * (D + H1p + H2p) * itemsize
    vmem_limit = int(min(2 * weight_bytes + 4 * tile_bytes + (8 << 20), 48 << 20))

    out_shapes = (jax.ShapeDtypeStruct((B, H1p), x.dtype),
                  jax.ShapeDtypeStruct((B, H2p), x.dtype))

    def build(single_buffer_weights: bool):
        # Weights / biases have a constant index_map -> no re-fetch needed, so
        # single-buffer them to halve their VMEM footprint (v7x: 64 MiB VMEM).
        const_kw = ({"pipeline_mode": pl.Buffered(1)}
                    if single_buffer_weights else {})
        in_specs = [
            pl.BlockSpec((b_tile, D), lambda i: (i, 0)),          # x tile
            pl.BlockSpec((D, H1p), lambda i: (0, 0), **const_kw),  # W1^T
            pl.BlockSpec((1, H1p), lambda i: (0, 0), **const_kw),  # b1
            pl.BlockSpec((H1p, H2p), lambda i: (0, 0), **const_kw),  # W2^T
            pl.BlockSpec((1, H2p), lambda i: (0, 0), **const_kw),  # b2
        ]
        out_specs = (
            pl.BlockSpec((b_tile, H1p), lambda i: (i, 0)),        # x1 tile
            pl.BlockSpec((b_tile, H2p), lambda i: (i, 0)),        # x2 tile
        )
        return pl.pallas_call(
            feature_extractor_kernel,
            out_shape=out_shapes,
            grid=grid,
            in_specs=in_specs,
            out_specs=out_specs,
            compiler_params=pltpu.CompilerParams(
                dimension_semantics=("parallel",),
                vmem_limit_bytes=vmem_limit),
            cost_estimate=cost,
        )

    args = (x, w1_t, b1_2d, w2_t, b2_2d)
    try:
        x1_p, x2_p = build(True)(*args)
    except Exception:
        # Some jaxlib versions reject single-buffered BlockSpecs; fall back to
        # the default double-buffered pipeline (identical math).
        x1_p, x2_p = build(False)(*args)

    x1 = x1_p if H1p == H1 else x1_p[:, :H1]
    x2 = x2_p if H2p == H2 else x2_p[:, :H2]
    return x1, x2


def _reference(x, w1, b1, w2, b2):
    """Pure-JAX mirror of the PyTorch forward (fc -> relu -> fc -> relu)."""
    x1 = jnp.maximum(x @ w1.T + b1, 0.0)
    x2 = jnp.maximum(x1 @ w2.T + b2, 0.0)
    return x1, x2


if __name__ == "__main__":
    # FeatureExtractor(input_size=32, hidden_1=128, hidden_2=64), batch=16.
    B, D, H1, H2 = 16, 32, 128, 64

    key = jax.random.PRNGKey(0)
    kx, kw1, kb1, kw2, kb2 = jax.random.split(key, 5)
    x = jax.random.normal(kx, (B, D), dtype=jnp.float32)
    # nn.Linear stores weight as (out_features, in_features)
    w1 = jax.random.normal(kw1, (H1, D), dtype=jnp.float32) * (1.0 / D ** 0.5)
    b1 = jax.random.normal(kb1, (H1,), dtype=jnp.float32) * 0.1
    w2 = jax.random.normal(kw2, (H2, H1), dtype=jnp.float32) * (1.0 / H1 ** 0.5)
    b2 = jax.random.normal(kb2, (H2,), dtype=jnp.float32) * 0.1

    x1, x2 = feature_extractor(x, w1, b1, w2, b2)
    x1, x2 = jax.block_until_ready((x1, x2))

    r1, r2 = _reference(x, w1, b1, w2, b2)
    assert x1.shape == (B, H1) and x2.shape == (B, H2)
    assert jnp.allclose(x1, r1, atol=1e-4, rtol=1e-4), "x1 mismatch vs reference"
    assert jnp.allclose(x2, r2, atol=1e-4, rtol=1e-4), "x2 mismatch vs reference"

    print("KERNEL_OK")
</pallas_src>

<mosaic_0001>
module attributes {stable_mosaic.version = 11 : i64} {
  func.func @feature_extractor_kernel(%arg0: i32, %arg1: memref<16x32xf32, #tpu.memory_space<vmem>>, %arg2: memref<32x128xf32, #tpu.memory_space<vmem>>, %arg3: memref<1x128xf32, #tpu.memory_space<vmem>>, %arg4: memref<128x128xf32, #tpu.memory_space<vmem>>, %arg5: memref<1x128xf32, #tpu.memory_space<vmem>>, %arg6: memref<16x128xf32, #tpu.memory_space<vmem>>, %arg7: memref<16x128xf32, #tpu.memory_space<vmem>>) attributes {dimension_semantics = [#tpu.dimension_semantics<parallel>], iteration_bounds = array<i64: 1>, scalar_prefetch = 0 : i64, scratch_operands = 0 : i64, tpu.core_type = #tpu.core_type<tc>, window_params = [{transform_indices = @transform_0, window_bounds = array<i64: 16, 32>}, {pipeline_mode = #tpu.pipeline_mode<synchronous>, transform_indices = @transform_1, window_bounds = array<i64: 32, 128>}, {pipeline_mode = #tpu.pipeline_mode<synchronous>, transform_indices = @transform_2, window_bounds = array<i64: 1, 128>}, {pipeline_mode = #tpu.pipeline_mode<synchronous>, transform_indices = @transform_3, window_bounds = array<i64: 128, 128>}, {pipeline_mode = #tpu.pipeline_mode<synchronous>, transform_indices = @transform_4, window_bounds = array<i64: 1, 128>}, {transform_indices = @transform_5, window_bounds = array<i64: 16, 128>}, {transform_indices = @transform_6, window_bounds = array<i64: 16, 128>}]} {
    %c0 = arith.constant 0 : index
    %c0_0 = arith.constant 0 : index
    %0 = vector.load %arg1[%c0, %c0_0] : memref<16x32xf32, #tpu.memory_space<vmem>>, vector<16x32xf32>
    %c0_1 = arith.constant 0 : index
    %c0_2 = arith.constant 0 : index
    %1 = vector.load %arg2[%c0_1, %c0_2] : memref<32x128xf32, #tpu.memory_space<vmem>>, vector<32x128xf32>
    %cst = arith.constant dense<0.000000e+00> : vector<16x128xf32>
    %2 = tpu.matmul %0, %1, %cst {dimension_numbers = #tpu.dot_dimension_numbers<[1], [0], [0], [1], [0, 0, 1, 1], [], []>} : vector<16x32xf32>, vector<32x128xf32>, vector<16x128xf32> -> vector<16x128xf32>
    %c0_3 = arith.constant 0 : index
    %c0_4 = arith.constant 0 : index
    %3 = vector.load %arg3[%c0_3, %c0_4] : memref<1x128xf32, #tpu.memory_space<vmem>>, vector<1x128xf32>
    %4 = vector.broadcast %3 : vector<1x128xf32> to vector<16x128xf32>
    %5 = arith.addf %2, %4 : vector<16x128xf32>
    %cst_5 = arith.constant 0.000000e+00 : f32
    %6 = vector.broadcast %cst_5 : f32 to vector<16x128xf32>
    %7 = arith.maximumf %5, %6 : vector<16x128xf32>
    %c0_6 = arith.constant 0 : index
    %c0_7 = arith.constant 0 : index
    %8 = vector.load %arg6[%c0_6, %c0_7] : memref<16x128xf32, #tpu.memory_space<vmem>>, vector<16x128xf32>
    tpu.vector_store %arg6[%c0_6, %c0_7], %7 {strides = array<i32>} : memref<16x128xf32, #tpu.memory_space<vmem>>, vector<16x128xf32>,
    %c0_8 = arith.constant 0 : index
    %c0_9 = arith.constant 0 : index
    %9 = vector.load %arg4[%c0_8, %c0_9] : memref<128x128xf32, #tpu.memory_space<vmem>>, vector<128x128xf32>
    %cst_10 = arith.constant dense<0.000000e+00> : vector<16x128xf32>
    %10 = tpu.matmul %7, %9, %cst_10 {dimension_numbers = #tpu.dot_dimension_numbers<[1], [0], [0], [1], [0, 0, 1, 1], [], []>} : vector<16x128xf32>, vector<128x128xf32>, vector<16x128xf32> -> vector<16x128xf32>
    %c0_11 = arith.constant 0 : index
    %c0_12 = arith.constant 0 : index
    %11 = vector.load %arg5[%c0_11, %c0_12] : memref<1x128xf32, #tpu.memory_space<vmem>>, vector<1x128xf32>
    %12 = vector.broadcast %11 : vector<1x128xf32> to vector<16x128xf32>
    %13 = arith.addf %10, %12 : vector<16x128xf32>
    %cst_13 = arith.constant 0.000000e+00 : f32
    %14 = vector.broadcast %cst_13 : f32 to vector<16x128xf32>
    %15 = arith.maximumf %13, %14 : vector<16x128xf32>
    %c0_14 = arith.constant 0 : index
    %c0_15 = arith.constant 0 : index
    %16 = vector.load %arg7[%c0_14, %c0_15] : memref<16x128xf32, #tpu.memory_space<vmem>>, vector<16x128xf32>
    tpu.vector_store %arg7[%c0_14, %c0_15], %15 {strides = array<i32>} : memref<16x128xf32, #tpu.memory_space<vmem>>, vector<16x128xf32>,
    return
  }
  func.func @transform_0(%arg0: i32) -> (i32, i32) {
    %c0_i32 = arith.constant 0 : i32
    %c0_i32_0 = arith.constant 0 : i32
    return %arg0, %c0_i32 : i32, i32
  }
  func.func @transform_1(%arg0: i32) -> (i32, i32) {
    %c0_i32 = arith.constant 0 : i32
    %c0_i32_0 = arith.constant 0 : i32
    %c0_i32_1 = arith.constant 0 : i32
    return %c0_i32, %c0_i32_0 : i32, i32
  }
  func.func @transform_2(%arg0: i32) -> (i32, i32) {
    %c0_i32 = arith.constant 0 : i32
    %c0_i32_0 = arith.constant 0 : i32
    %c0_i32_1 = arith.constant 0 : i32
    return %c0_i32, %c0_i32_0 : i32, i32
  }
  func.func @transform_3(%arg0: i32) -> (i32, i32) {
    %c0_i32 = arith.constant 0 : i32
    %c0_i32_0 = arith.constant 0 : i32
    %c0_i32_1 = arith.constant 0 : i32
    return %c0_i32, %c0_i32_0 : i32, i32
  }
  func.func @transform_4(%arg0: i32) -> (i32, i32) {
    %c0_i32 = arith.constant 0 : i32
    %c0_i32_0 = arith.constant 0 : i32
    %c0_i32_1 = arith.constant 0 : i32
    return %c0_i32, %c0_i32_0 : i32, i32
  }
  func.func @transform_5(%arg0: i32) -> (i32, i32) {
    %c0_i32 = arith.constant 0 : i32
    %c0_i32_0 = arith.constant 0 : i32
    return %arg0, %c0_i32 : i32, i32
  }
  func.func @transform_6(%arg0: i32) -> (i32, i32) {
    %c0_i32 = arith.constant 0 : i32
    %c0_i32_0 = arith.constant 0 : i32
    return %arg0, %c0_i32 : i32, i32
  }
}

module attributes {stable_mosaic.version = 11 : i64} {
  func.func @feature_extractor_kernel(%arg0: i32, %arg1: memref<16x32xf32, #tpu.memory_space<vmem>>, %arg2: memref<32x128xf32, #tpu.memory_space<vmem>>, %arg3: memref<1x128xf32, #tpu.memory_space<vmem>>, %arg4: memref<128x128xf32, #tpu.memory_space<vmem>>, %arg5: memref<1x128xf32, #tpu.memory_space<vmem>>, %arg6: memref<16x128xf32, #tpu.memory_space<vmem>>, %arg7: memref<16x128xf32, #tpu.memory_space<vmem>>) attributes {dimension_semantics = [#tpu.dimension_semantics<parallel>], iteration_bounds = array<i64: 1>, scalar_prefetch = 0 : i64, scratch_operands = 0 : i64, tpu.core_type = #tpu.core_type<tc>, window_params = [{transform_indices = @transform_0, window_bounds = array<i64: 16, 32>}, {pipeline_mode = #tpu.pipeline_mode<synchronous>, transform_indices = @transform_1, window_bounds = array<i64: 32, 128>}, {pipeline_mode = #tpu.pipeline_mode<synchronous>, transform_indices = @transform_2, window_bounds = array<i64: 1, 128>}, {pipeline_mode = #tpu.pipeline_mode<synchronous>, transform_indices = @transform_3, window_bounds = array<i64: 128, 128>}, {pipeline_mode = #tpu.pipeline_mode<synchronous>, transform_indices = @transform_4, window_bounds = array<i64: 1, 128>}, {transform_indices = @transform_5, window_bounds = array<i64: 16, 128>}, {transform_indices = @transform_6, window_bounds = array<i64: 16, 128>}]} {
    %c0 = arith.constant 0 : index
    %c0_0 = arith.constant 0 : index
    %0 = vector.load %arg1[%c0, %c0_0] : memref<16x32xf32, #tpu.memory_space<vmem>>, vector<16x32xf32>
    %c0_1 = arith.constant 0 : index
    %c0_2 = arith.constant 0 : index
    %1 = vector.load %arg2[%c0_1, %c0_2] : memref<32x128xf32, #tpu.memory_space<vmem>>, vector<32x128xf32>
    %cst = arith.constant dense<0.000000e+00> : vector<16x128xf32>
    %2 = tpu.matmul %0, %1, %cst {dimension_numbers = #tpu.dot_dimension_numbers<[1], [0], [0], [1], [0, 0, 1, 1], [], []>} : vector<16x32xf32>, vector<32x128xf32>, vector<16x128xf32> -> vector<16x128xf32>
    %c0_3 = arith.constant 0 : index
    %c0_4 = arith.constant 0 : index
    %3 = vector.load %arg3[%c0_3, %c0_4] : memref<1x128xf32, #tpu.memory_space<vmem>>, vector<1x128xf32>
    %4 = vector.broadcast %3 : vector<1x128xf32> to vector<16x128xf32>
    %5 = arith.addf %2, %4 : vector<16x128xf32>
    %cst_5 = arith.constant 0.000000e+00 : f32
    %6 = vector.broadcast %cst_5 : f32 to vector<16x128xf32>
    %7 = arith.maximumf %5, %6 : vector<16x128xf32>
    %c0_6 = arith.constant 0 : index
    %c0_7 = arith.constant 0 : index
    %8 = vector.load %arg6[%c0_6, %c0_7] : memref<16x128xf32, #tpu.memory_space<vmem>>, vector<16x128xf32>
    tpu.vector_store %arg6[%c0_6, %c0_7], %7 {strides = array<i32>} : memref<16x128xf32, #tpu.memory_space<vmem>>, vector<16x128xf32>,
    %c0_8 = arith.constant 0 : index
    %c0_9 = arith.constant 0 : index
    %9 = vector.load %arg4[%c0_8, %c0_9] : memref<128x128xf32, #tpu.memory_space<vmem>>, vector<128x128xf32>
    %cst_10 = arith.constant dense<0.000000e+00> : vector<16x128xf32>
    %10 = tpu.matmul %7, %9, %cst_10 {dimension_numbers = #tpu.dot_dimension_numbers<[1], [0], [0], [1], [0, 0, 1, 1], [], []>} : vector<16x128xf32>, vector<128x128xf32>, vector<16x128xf32> -> vector<16x128xf32>
    %c0_11 = arith.constant 0 : index
    %c0_12 = arith.constant 0 : index
    %11 = vector.load %arg5[%c0_11, %c0_12] : memref<1x128xf32, #tpu.memory_space<vmem>>, vector<1x128xf32>
    %12 = vector.broadcast %11 : vector<1x128xf32> to vector<16x128xf32>
    %13 = arith.addf %10, %12 : vector<16x128xf32>
    %cst_13 = arith.constant 0.000000e+00 : f32
    %14 = vector.broadcast %cst_13 : f32 to vector<16x128xf32>
    %15 = arith.maximumf %13, %14 : vector<16x128xf32>
    %c0_14 = arith.constant 0 : index
    %c0_15 = arith.constant 0 : index
    %16 = vector.load %arg7[%c0_14, %c0_15] : memref<16x128xf32, #tpu.memory_space<vmem>>, vector<16x128xf32>
    tpu.vector_store %arg7[%c0_14, %c0_15], %15 {strides = array<i32>} : memref<16x128xf32, #tpu.memory_space<vmem>>, vector<16x128xf32>,
    return
  }
  func.func @transform_0(%arg0: i32) -> (i32, i32) {
    %c0_i32 = arith.constant 0 : i32
    %c0_i32_0 = arith.constant 0 : i32
    return %arg0, %c0_i32 : i32, i32
  }
  func.func @transform_1(%arg0: i32) -> (i32, i32) {
    %c0_i32 = arith.constant 0 : i32
    %c0_i32_0 = arith.constant 0 : i32
    %c0_i32_1 = arith.constant 0 : i32
    return %c0_i32, %c0_i32_0 : i32, i32
  }
  func.func @transform_2(%arg0: i32) -> (i32, i32) {
    %c0_i32 = arith.constant 0 : i32
    %c0_i32_0 = arith.constant 0 : i32
    %c0_i32_1 = arith.constant 0 : i32
    return %c0_i32, %c0_i32_0 : i32, i32
  }
  func.func @transform_3(%arg0: i32) -> (i32, i32) {
    %c0_i32 = arith.constant 0 : i32
    %c0_i32_0 = arith.constant 0 : i32
    %c0_i32_1 = arith.constant 0 : i32
    return %c0_i32, %c0_i32_0 : i32, i32
  }
  func.func @transform_4(%arg0: i32) -> (i32, i32) {
    %c0_i32 = arith.constant 0 : i32
    %c0_i32_0 = arith.constant 0 : i32
    %c0_i32_1 = arith.constant 0 : i32
    return %c0_i32, %c0_i32_0 : i32, i32
  }
  func.func @transform_5(%arg0: i32) -> (i32, i32) {
    %c0_i32 = arith.constant 0 : i32
    %c0_i32_0 = arith.constant 0 : i32
    return %arg0, %c0_i32 : i32, i32
  }
  func.func @transform_6(%arg0: i32) -> (i32, i32) {
    %c0_i32 = arith.constant 0 : i32
    %c0_i32_0 = arith.constant 0 : i32
    return %arg0, %c0_i32 : i32, i32
  }
}

</mosaic_0001>

<bundles_post_ra>
// kernel: tpu_custom_call.1
= control target key start
LH: loop header
LB: loop body
LE: loop exit
PB: predicated region body
PF: predicated region fallthrough
CT: control target
= control target key end

     0   :  { %12 = vsyncpa [#allocation3], 0  ;;  %s671_s0 = inlined_call_operand.hbm [shape: f32[16,32], index: 0, kind: input, shape index: {}]   ;;  %s672_s1 = inlined_call_operand.hbm [shape: f32[32,128], index: 1, kind: input, shape index: {}]   ;;  %s673_s2 = inlined_call_operand.vmem [shape: f32[1,128], index: 2, kind: input, shape index: {}]   ;;  %s674_s3 = inlined_call_operand.hbm [shape: f32[128,128], index: 3, kind: input, shape index: {}]   ;;  %s675_s4 = inlined_call_operand.vmem [shape: f32[1,128], index: 4, kind: input, shape index: {}]   ;;  %s676_s5 = inlined_call_operand.hbm [shape: f32[16,128], index: 5, kind: output, shape index: {0}]   ;;  %s677_s6 = inlined_call_operand.hbm [shape: f32[16,128], index: 6, kind: output, shape index: {1}]  }
   0x1   :  { %13 = vsyncpa [#allocation6], 0 }
   0x2   :  { %14 = vsyncpa [#allocation4], 0 }
   0x3   :  { %15 = vsyncpa [#allocation10], 0  ;;  %s539_s21 = smov [#allocation5]   ;;  %s540_s23 = smov [#allocation2]  }
   0x4   :  { %s33_s22 = sshll.u32 %s539_s21, 4  ;;  %s21_s24 = sshll.u32 %s540_s23, 4  ;;  %s34_s22 = int_to_ptr.vmem [resolvable:$true] %s33_s22  ;;  %s581_s24 = int_to_ptr.vmem [resolvable:$true] %s21_s24 }
   0x5   :  { %s421_s27 = scalar_lea.hbm %s672_s1, 512 }
   0x6   :  { %p422_p0 = scmp.ne.s32.totalorder %s672_s1, %s421_s27  ;;  %p425_p1 = scmp.lt.u32.totalorder %s421_s27, %s672_s1 }
   0x8   :  { %p427_p2 = pnand %p425_p1, %p422_p0 }
   0xa   :  { %430 = shalt.err (!%p427_p2)
}
   0xb   :  { %s431_s8 = scalar_lea.vmem %s34_s22, 512  ;;  %p436_p4 = scmp.lt.s32.totalorder %s34_s22, %s34_s22 }
   0xc   :  { %p432_p3 = scmp.ne.s32.totalorder %s34_s22, %s431_s8  ;;  %p437_p5 = scmp.lt.s32.totalorder %s431_s8, %s431_s8 }
   0xe   :  { %p438_p6 = por %p437_p5, %p436_p4 }
  0x10   :  { %p439_p7 = pnand %p438_p6, %p432_p3 }
  0x12   :  { %442 = shalt.err (!%p439_p7)
}
  0x13   :  { %s541_s9 = smov 128   ;;  %s542_s10 = smov 8  }
  0x14   :  { %39 = dma.hbm_to_vmem [thread:$0]  %s672_s1, 512, %s34_s22, [#allocation6], %s541_s9, %s541_s9, %s542_s10  }
  0x15   :  { %s443_s15 = scalar_lea.hbm %s671_s0, 256 }
  0x16   :  { %p444_p8 = scmp.ne.s32.totalorder %s671_s0, %s443_s15  ;;  %p447_p9 = scmp.lt.u32.totalorder %s443_s15, %s671_s0 }
  0x18   :  { %p449_p10 = pnand %p447_p9, %p444_p8 }
  0x1a   :  { %452 = shalt.err (!%p449_p10)
}
  0x1b   :  { %s453_s20 = scalar_lea.vmem %s581_s24, 256  ;;  %p458_p12 = scmp.lt.s32.totalorder %s581_s24, %s581_s24 }
  0x1c   :  { %p454_p11 = scmp.ne.s32.totalorder %s581_s24, %s453_s20  ;;  %p459_p13 = scmp.lt.s32.totalorder %s453_s20, %s453_s20 }
  0x1e   :  { %p460_p0 = por %p459_p13, %p458_p12 }
  0x20   :  { %p461_p1 = pnand %p460_p0, %p454_p11 }
  0x22   :  { %464 = shalt.err (!%p461_p1)
}
  0x23   :  { %27 = dma.hbm_to_vmem [thread:$0]  %s671_s0, 256, %s581_s24, [#allocation3], %s541_s9, %s541_s9, %s542_s10  }
  0x24   :  { %s543_s22 = smov [#allocation7]   ;;  %s465_s27 = scalar_lea.hbm %s674_s3, 2048 }
  0x25   :  { %s47_s23 = sshll.u32 %s543_s22, 4  ;;  %p466_p2 = scmp.ne.s32.totalorder %s674_s3, %s465_s27  ;;  %s48_s23 = int_to_ptr.vmem [resolvable:$true] %s47_s23 }
  0x26   :  { %p469_p3 = scmp.lt.u32.totalorder %s465_s27, %s674_s3 }
  0x28   :  { %p471_p4 = pnand %p469_p3, %p466_p2 }
  0x2a   :  { %474 = shalt.err (!%p471_p4)
}
  0x2b   :  { %s475_s8 = scalar_lea.vmem %s48_s23, 2048  ;;  %p480_p6 = scmp.lt.s32.totalorder %s48_s23, %s48_s23 }
  0x2c   :  { %p476_p5 = scmp.ne.s32.totalorder %s48_s23, %s475_s8  ;;  %p481_p7 = scmp.lt.s32.totalorder %s475_s8, %s475_s8 }
  0x2e   :  { %p482_p8 = por %p481_p7, %p480_p6 }
  0x30   :  { %p483_p9 = pnand %p482_p8, %p476_p5 }
  0x32   :  { %486 = shalt.err (!%p483_p9)
}
  0x33   :  { %53 = dma.hbm_to_vmem [thread:$0]  %s674_s3, 2048, %s48_s23, [#allocation6], %s541_s9, %s541_s9, %s542_s10  }
  0x34   :  { %531 = dma.done.wait [#allocation3], 256  }
  0x35   :  { %532 = vsyncadd [#allocation3], 4294967040 }
  0x36   :  { %533 = dma.done.wait [#allocation6], 2560  }
  0x37   :  { %534 = vsyncadd [#allocation6], 4294964736  ;;  %vm78_vm0 = vcmask 261120   ;;  %v67_v0 = vld [vmem:[#allocation5] sm:$0xff]  ;;  %v68_v1 = vld [vmem:[#allocation5 + $0x8] sm:$0xff]  ;;  %s544_s12 = smov [#allocation8]  }
  0x38   :  { %v69_v2 = vld [vmem:[#allocation5 + $0x10] sm:$0xff]  ;;  %v374_v3 = vpack.c.bf16 %v68_v1, %v67_v0  ;;  %v70_v4 = vld [vmem:[#allocation5 + $0x18] sm:$0xff]  ;;  %v164_v7 = vld [vmem:[#allocation7] sm:$0xff]  ;;  %s271_s13 = sshll.u32 %s544_s12, 4  ;;  %s272_s13 = int_to_ptr.vmem [resolvable:$true] %s271_s13 }
  0x39   :  { %v65_v5 = vld [vmem:[#allocation2] sm:$0xff]  ;;  %v378_v6 = vpack.c.bf16 %v70_v4, %v69_v2  ;;  %v165_v8 = vld [vmem:[#allocation7 + $0x8] sm:$0xff]  ;;  %v167_v11 = vld [vmem:[#allocation7 + $0x18] sm:$0xff]  ;;  %s487_s14 = scalar_lea.vmem %s272_s13, 256  ;;  %p492_p11 = scmp.lt.s32.totalorder %s272_s13, %s272_s13 }
  0x3a   :  { %336 = vmatprep.mubr.msk.f32.mxu0 %vm78_vm0, %v65_v5  ;;  %v166_v9 = vld [vmem:[#allocation7 + $0x10] sm:$0xff]  ;;  %375 = vmatprep.subr.bf16.mxu0 %v374_v3  ;;  %v382_v10 = vpack.c.bf16 %v165_v8, %v164_v7  ;;  %v168_v13 = vld [vmem:[#allocation7 + $0x20] sm:$0xff]  ;;  %v169_v14 = vld [vmem:[#allocation7 + $0x28] sm:$0xff]  ;;  %p488_p10 = scmp.ne.s32.totalorder %s272_s13, %s487_s14  ;;  %p493_p12 = scmp.lt.s32.totalorder %s487_s14, %s487_s14 }
  0x3b   :  { %377 = vmatpush3.bf16.msra.mxu0 %v374_v3  ;;  %v386_v12 = vpack.c.bf16 %v167_v11, %v166_v9  ;;  %v390_v15 = vpack.c.bf16 %v169_v14, %v168_v13  ;;  %v66_v16 = vld [vmem:[#allocation2 + $0x8] sm:$0xff]  ;;  %v170_v17 = vld [vmem:[#allocation7 + $0x30] sm:$0xff]  ;;  %v172_v20 = vld [vmem:[#allocation7 + $0x40] sm:$0xff] }
  0x3c   :  { %379 = vmatprep.subr.bf16.mxu0 %v378_v6  ;;  %383 = vmatprep.subr.bf16.mxu1 %v382_v10  ;;  %v171_v18 = vld [vmem:[#allocation7 + $0x38] sm:$0xff]  ;;  %v173_v21 = vld [vmem:[#allocation7 + $0x48] sm:$0xff]  ;;  %v174_v23 = vld [vmem:[#allocation7 + $0x50] sm:$0xff]  ;;  %p494_p13 = por %p493_p12, %p492_p11 }
  0x3d   :  { %385 = vmatpush3.bf16.msra.mxu1 %v382_v10  ;;  %v394_v19 = vpack.c.bf16 %v171_v18, %v170_v17  ;;  %v398_v22 = vpack.c.bf16 %v173_v21, %v172_v20  ;;  %v175_v24 = vld [vmem:[#allocation7 + $0x58] sm:$0xff]  ;;  %v176_v26 = vld [vmem:[#allocation7 + $0x60] sm:$0xff]  ;;  %v177_v27 = vld [vmem:[#allocation7 + $0x68] sm:$0xff] }
  0x3e   :  { %387 = vmatprep.subr.bf16.mxu1 %v386_v12  ;;  %v402_v25 = vpack.c.bf16 %v175_v24, %v174_v23  ;;  %v406_v28 = vpack.c.bf16 %v177_v27, %v176_v26  ;;  %v178_v29 = vld [vmem:[#allocation7 + $0x70] sm:$0xff]  ;;  %v179_v30 = vld [vmem:[#allocation7 + $0x78] sm:$0xff]  ;;  %p495_p0 = pnand %p494_p13, %p488_p10 }
  0x3f   :  { %381 = vmatpush3.bf16.msra.mxu0 %v378_v6  ;;  %v410_v31 = vpack.c.bf16 %v179_v30, %v178_v29  ;;  %v300_v32 = vld [vmem:[%s673_s2] ss:$0 sm:$0xff] }
  0x41   :  { %389 = vmatpush3.bf16.msra.mxu1 %v386_v12 }
  0x42   :  { %337 = vmatmul.mubr.msk.f32.vlgmr.msra.gmra.mrb[0].mxu0 %vm78_vm0, %v66_v16  ;;  %391 = vmatprep.subr.bf16.mxu1 %v390_v15 }
  0x45   :  { %393 = vmatpush3.bf16.msra.mxu1 %v390_v15 }
  0x46   :  { %395 = vmatprep.subr.bf16.mxu1 %v394_v19 }
  0x49   :  { %397 = vmatpush3.bf16.msra.mxu1 %v394_v19 }
  0x4a   :  { %399 = vmatprep.subr.bf16.mxu1 %v398_v22 }
  0x4d   :  { %401 = vmatpush3.bf16.msra.mxu1 %v398_v22 }
  0x4e   :  { %403 = vmatprep.subr.bf16.mxu1 %v402_v25 }
  0x51   :  { %405 = vmatpush3.bf16.msra.mxu1 %v402_v25 }
  0x52   :  { %407 = vmatprep.subr.bf16.mxu1 %v406_v28 }
  0x55   :  { %409 = vmatpush3.bf16.msra.mxu1 %v406_v28 }
  0x56   :  { %411 = vmatprep.subr.bf16.mxu1 %v410_v31 }
  0x59   :  { %413 = vmatpush3.bf16.msra.mxu1 %v410_v31 }
 0x115   :  { %v338_v33 = vpop.f32.mrb[0].mxu0 }
 0x116   :  { %v157_v34 = vadd.f32 %v338_v33, %v300_v32  ;;  %v151_v35 = vpop.f32.mrb[1].mxu0 }
 0x117   :  { %v152_v36 = vadd.f32 %v300_v32, %v151_v35 }
 0x118   :  { %v161_v37 = vmax.f32 %v157_v34, 0.0 }
 0x119   :  { %v160_v38 = vmax.f32 %v152_v36, 0.0 }
 0x11a   :  { %163 = vst [vmem:[#allocation8 + $0x8] sm:$0xff] %v161_v37 }
 0x11b   :  { %162 = vst [vmem:[#allocation8] sm:$0xff] %v160_v38  ;;  %371 = vmatprep.mubr.f32.mxu1 %v160_v38 }
 0x11c   :  { %372 = vmatmul.mubr.f32.vlgmr.msra.gmra.mrb[0].mxu1 %v161_v37 }
 0x11d   :  { %498 = shalt.err (!%p495_p0)
}
 0x11e   :  { %s499_s16 = scalar_lea.hbm %s676_s5, 256 }
 0x11f   :  { %p500_p1 = scmp.ne.s32.totalorder %s676_s5, %s499_s16  ;;  %p503_p2 = scmp.lt.u32.totalorder %s499_s16, %s676_s5 }
 0x121   :  { %p505_p3 = pnand %p503_p2, %p500_p1 }
 0x123   :  { %508 = shalt.err (!%p505_p3)
}
 0x124   :  { %277 = dma.vmem_to_hbm [thread:$0]  %s272_s13, 256, %s676_s5, [#allocation4], %s541_s9, %s541_s9, %s542_s10  }
 0x125   :  { %v303_v39 = vld [vmem:[%s675_s4] ss:$0 sm:$0xff]  ;;  %s545_s25 = smov [#allocation9]  }
 0x126   :  { %s283_s26 = sshll.u32 %s545_s25, 4  ;;  %s284_s26 = int_to_ptr.vmem [resolvable:$true] %s283_s26 }
 0x127   :  { %s509_s27 = scalar_lea.vmem %s284_s26, 256  ;;  %p514_p5 = scmp.lt.s32.totalorder %s284_s26, %s284_s26 }
 0x128   :  { %p510_p4 = scmp.ne.s32.totalorder %s284_s26, %s509_s27  ;;  %p515_p6 = scmp.lt.s32.totalorder %s509_s27, %s509_s27 }
 0x12a   :  { %p516_p7 = por %p515_p6, %p514_p5 }
 0x12c   :  { %p517_p8 = pnand %p516_p7, %p510_p4 }
 0x1ef   :  { %v373_v40 = vpop.f32.mrb[0].mxu1 }
 0x1f0   :  { %v259_v41 = vadd.f32 %v373_v40, %v303_v39  ;;  %v253_v42 = vpop.f32.mrb[1].mxu1 }
 0x1f1   :  { %v254_v43 = vadd.f32 %v303_v39, %v253_v42 }
 0x1f2   :  { %v263_v44 = vmax.f32 %v259_v41, 0.0 }
 0x1f3   :  { %v262_v45 = vmax.f32 %v254_v43, 0.0 }
 0x1f4   :  { %265 = vst [vmem:[#allocation9 + $0x8] sm:$0xff] %v263_v44 }
 0x1f5   :  { %264 = vst [vmem:[#allocation9] sm:$0xff] %v262_v45 }
 0x1f6   :  { %520 = shalt.err (!%p517_p8)
}
 0x1f7   :  { %s521_s28 = scalar_lea.hbm %s677_s6, 256 }
 0x1f8   :  { %p522_p9 = scmp.ne.s32.totalorder %s677_s6, %s521_s28  ;;  %p525_p10 = scmp.lt.u32.totalorder %s521_s28, %s677_s6 }
 0x1fa   :  { %p527_p11 = pnand %p525_p10, %p522_p9 }
 0x1fc   :  { %530 = shalt.err (!%p527_p11)
}
 0x1fd   :  { %289 = dma.vmem_to_hbm [thread:$0]  %s284_s26, 256, %s677_s6, [#allocation10], %s541_s9, %s541_s9, %s542_s10  }
 0x1fe   :  { %535 = dma.done.wait [#allocation4], 256  }
 0x1ff   :  { %536 = vsyncadd [#allocation4], 4294967040 }
 0x200   :  { %537 = dma.done.wait [#allocation10], 256  }
 0x201   :  { %538 = vsyncadd [#allocation10], 4294967040 }
 0x202   :  { %296 = vsyncpa [#allocation3], 1 }
 0x203   :  { %297 = vsyncpa [#allocation6], 1 }
 0x204   :  { %298 = vsyncpa [#allocation4], 1 }
 0x205   :  { %299 = vsyncpa [#allocation10], 1 }

// kernel: tpu_custom_call.1
= control target key start
LH: loop header
LB: loop body
LE: loop exit
PB: predicated region body
PF: predicated region fallthrough
CT: control target
= control target key end

     0   :  { %12 = vsyncpa [#allocation3], 0  ;;  %s671_s0 = inlined_call_operand.hbm [shape: f32[16,32], index: 0, kind: input, shape index: {}]   ;;  %s672_s1 = inlined_call_operand.hbm [shape: f32[32,128], index: 1, kind: input, shape index: {}]   ;;  %s673_s2 = inlined_call_operand.vmem [shape: f32[1,128], index: 2, kind: input, shape index: {}]   ;;  %s674_s3 = inlined_call_operand.hbm [shape: f32[128,128], index: 3, kind: input, shape index: {}]   ;;  %s675_s4 = inlined_call_operand.vmem [shape: f32[1,128], index: 4, kind: input, shape index: {}]   ;;  %s676_s5 = inlined_call_operand.hbm [shape: f32[16,128], index: 5, kind: output, shape index: {0}]   ;;  %s677_s6 = inlined_call_operand.hbm [shape: f32[16,128], index: 6, kind: output, shape index: {1}]  }
   0x1   :  { %13 = vsyncpa [#allocation6], 0 }
   0x2   :  { %14 = vsyncpa [#allocation4], 0 }
   0x3   :  { %15 = vsyncpa [#allocation10], 0  ;;  %s539_s21 = smov [#allocation5]   ;;  %s540_s23 = smov [#allocation2]  }
   0x4   :  { %s33_s22 = sshll.u32 %s539_s21, 4  ;;  %s21_s24 = sshll.u32 %s540_s23, 4  ;;  %s34_s22 = int_to_ptr.vmem [resolvable:$true] %s33_s22  ;;  %s581_s24 = int_to_ptr.vmem [resolvable:$true] %s21_s24 }
   0x5   :  { %s421_s27 = scalar_lea.hbm %s672_s1, 512 }
   0x6   :  { %p422_p0 = scmp.ne.s32.totalorder %s672_s1, %s421_s27  ;;  %p425_p1 = scmp.lt.u32.totalorder %s421_s27, %s672_s1 }
   0x8   :  { %p427_p2 = pnand %p425_p1, %p422_p0 }
   0xa   :  { %430 = shalt.err (!%p427_p2)
}
   0xb   :  { %s431_s8 = scalar_lea.vmem %s34_s22, 512  ;;  %p436_p4 = scmp.lt.s32.totalorder %s34_s22, %s34_s22 }
   0xc   :  { %p432_p3 = scmp.ne.s32.totalorder %s34_s22, %s431_s8  ;;  %p437_p5 = scmp.lt.s32.totalorder %s431_s8, %s431_s8 }
   0xe   :  { %p438_p6 = por %p437_p5, %p436_p4 }
  0x10   :  { %p439_p7 = pnand %p438_p6, %p432_p3 }
  0x12   :  { %442 = shalt.err (!%p439_p7)
}
  0x13   :  { %s541_s9 = smov 128   ;;  %s542_s10 = smov 8  }
  0x14   :  { %39 = dma.hbm_to_vmem [thread:$0]  %s672_s1, 512, %s34_s22, [#allocation6], %s541_s9, %s541_s9, %s542_s10  }
  0x15   :  { %s443_s15 = scalar_lea.hbm %s671_s0, 256 }
  0x16   :  { %p444_p8 = scmp.ne.s32.totalorder %s671_s0, %s443_s15  ;;  %p447_p9 = scmp.lt.u32.totalorder %s443_s15, %s671_s0 }
  0x18   :  { %p449_p10 = pnand %p447_p9, %p444_p8 }
  0x1a   :  { %452 = shalt.err (!%p449_p10)
}
  0x1b   :  { %s453_s20 = scalar_lea.vmem %s581_s24, 256  ;;  %p458_p12 = scmp.lt.s32.totalorder %s581_s24, %s581_s24 }
  0x1c   :  { %p454_p11 = scmp.ne.s32.totalorder %s581_s24, %s453_s20  ;;  %p459_p13 = scmp.lt.s32.totalorder %s453_s20, %s453_s20 }
  0x1e   :  { %p460_p0 = por %p459_p13, %p458_p12 }
  0x20   :  { %p461_p1 = pnand %p460_p0, %p454_p11 }
  0x22   :  { %464 = shalt.err (!%p461_p1)
}
  0x23   :  { %27 = dma.hbm_to_vmem [thread:$0]  %s671_s0, 256, %s581_s24, [#allocation3], %s541_s9, %s541_s9, %s542_s10  }
  0x24   :  { %s543_s22 = smov [#allocation7]   ;;  %s465_s27 = scalar_lea.hbm %s674_s3, 2048 }
  0x25   :  { %s47_s23 = sshll.u32 %s543_s22, 4  ;;  %p466_p2 = scmp.ne.s32.totalorder %s674_s3, %s465_s27  ;;  %s48_s23 = int_to_ptr.vmem [resolvable:$true] %s47_s23 }
  0x26   :  { %p469_p3 = scmp.lt.u32.totalorder %s465_s27, %s674_s3 }
  0x28   :  { %p471_p4 = pnand %p469_p3, %p466_p2 }
  0x2a   :  { %474 = shalt.err (!%p471_p4)
}
  0x2b   :  { %s475_s8 = scalar_lea.vmem %s48_s23, 2048  ;;  %p480_p6 = scmp.lt.s32.totalorder %s48_s23, %s48_s23 }
  0x2c   :  { %p476_p5 = scmp.ne.s32.totalorder %s48_s23, %s475_s8  ;;  %p481_p7 = scmp.lt.s32.totalorder %s475_s8, %s475_s8 }
  0x2e   :  { %p482_p8 = por %p481_p7, %p480_p6 }
  0x30   :  { %p483_p9 = pnand %p482_p8, %p476_p5 }
  0x32   :  { %486 = shalt.err (!%p483_p9)
}
  0x33   :  { %53 = dma.hbm_to_vmem [thread:$0]  %s674_s3, 2048, %s48_s23, [#allocation6], %s541_s9, %s541_s9, %s542_s10  }
  0x34   :  { %531 = dma.done.wait [#allocation3], 256  }
  0x35   :  { %532 = vsyncadd [#allocation3], 4294967040 }
  0x36   :  { %533 = dma.done.wait [#allocation6], 2560  }
  0x37   :  { %534 = vsyncadd [#allocation6], 4294964736  ;;  %vm78_vm0 = vcmask 261120   ;;  %v67_v0 = vld [vmem:[#allocation5] sm:$0xff]  ;;  %v68_v1 = vld [vmem:[#allocation5 + $0x8] sm:$0xff]  ;;  %s544_s12 = smov [#allocation8]  }
  0x38   :  { %v69_v2 = vld [vmem:[#allocation5 + $0x10] sm:$0xff]  ;;  %v374_v3 = vpack.c.bf16 %v68_v1, %v67_v0  ;;  %v70_v4 = vld [vmem:[#allocation5 + $0x18] sm:$0xff]  ;;  %v164_v7 = vld [vmem:[#allocation7] sm:$0xff]  ;;  %s271_s13 = sshll.u32 %s544_s12, 4  ;;  %s272_s13 = int_to_ptr.vmem [resolvable:$true] %s271_s13 }
  0x39   :  { %v65_v5 = vld [vmem:[#allocation2] sm:$0xff]  ;;  %v378_v6 = vpack.c.bf16 %v70_v4, %v69_v2  ;;  %v165_v8 = vld [vmem:[#allocation7 + $0x8] sm:$0xff]  ;;  %v167_v11 = vld [vmem:[#allocation7 + $0x18] sm:$0xff]  ;;  %s487_s14 = scalar_lea.vmem %s272_s13, 256  ;;  %p492_p11 = scmp.lt.s32.totalorder %s272_s13, %s272_s13 }
  0x3a   :  { %336 = vmatprep.mubr.msk.f32.mxu0 %vm78_vm0, %v65_v5  ;;  %v166_v9 = vld [vmem:[#allocation7 + $0x10] sm:$0xff]  ;;  %375 = vmatprep.subr.bf16.mxu0 %v374_v3  ;;  %v382_v10 = vpack.c.bf16 %v165_v8, %v164_v7  ;;  %v168_v13 = vld [vmem:[#allocation7 + $0x20] sm:$0xff]  ;;  %v169_v14 = vld [vmem:[#allocation7 + $0x28] sm:$0xff]  ;;  %p488_p10 = scmp.ne.s32.totalorder %s272_s13, %s487_s14  ;;  %p493_p12 = scmp.lt.s32.totalorder %s487_s14, %s487_s14 }
  0x3b   :  { %377 = vmatpush3.bf16.msra.mxu0 %v374_v3  ;;  %v386_v12 = vpack.c.bf16 %v167_v11, %v166_v9  ;;  %v390_v15 = vpack.c.bf16 %v169_v14, %v168_v13  ;;  %v66_v16 = vld [vmem:[#allocation2 + $0x8] sm:$0xff]  ;;  %v170_v17 = vld [vmem:[#allocation7 + $0x30] sm:$0xff]  ;;  %v172_v20 = vld [vmem:[#allocation7 + $0x40] sm:$0xff] }
  0x3c   :  { %379 = vmatprep.subr.bf16.mxu0 %v378_v6  ;;  %383 = vmatprep.subr.bf16.mxu1 %v382_v10  ;;  %v171_v18 = vld [vmem:[#allocation7 + $0x38] sm:$0xff]  ;;  %v173_v21 = vld [vmem:[#allocation7 + $0x48] sm:$0xff]  ;;  %v174_v23 = vld [vmem:[#allocation7 + $0x50] sm:$0xff]  ;;  %p494_p13 = por %p493_p12, %p492_p11 }
  0x3d   :  { %385 = vmatpush3.bf16.msra.mxu1 %v382_v10  ;;  %v394_v19 = vpack.c.bf16 %v171_v18, %v170_v17  ;;  %v398_v22 = vpack.c.bf16 %v173_v21, %v172_v20  ;;  %v175_v24 = vld [vmem:[#allocation7 + $0x58] sm:$0xff]  ;;  %v176_v26 = vld [vmem:[#allocation7 + $0x60] sm:$0xff]  ;;  %v177_v27 = vld [vmem:[#allocation7 + $0x68] sm:$0xff] }
  0x3e   :  { %387 = vmatprep.subr.bf16.mxu1 %v386_v12  ;;  %v402_v25 = vpack.c.bf16 %v175_v24, %v174_v23  ;;  %v406_v28 = vpack.c.bf16 %v177_v27, %v176_v26  ;;  %v178_v29 = vld [vmem:[#allocation7 + $0x70] sm:$0xff]  ;;  %v179_v30 = vld [vmem:[#allocation7 + $0x78] sm:$0xff]  ;;  %p495_p0 = pnand %p494_p13, %p488_p10 }
  0x3f   :  { %381 = vmatpush3.bf16.msra.mxu0 %v378_v6  ;;  %v410_v31 = vpack.c.bf16 %v179_v30, %v178_v29  ;;  %v300_v32 = vld [vmem:[%s673_s2] ss:$0 sm:$0xff] }
  0x41   :  { %389 = vmatpush3.bf16.msra.mxu1 %v386_v12 }
  0x42   :  { %337 = vmatmul.mubr.msk.f32.vlgmr.msra.gmra.mrb[0].mxu0 %vm78_vm0, %v66_v16  ;;  %391 = vmatprep.subr.bf16.mxu1 %v390_v15 }
  0x45   :  { %393 = vmatpush3.bf16.msra.mxu1 %v390_v15 }
  0x46   :  { %395 = vmatprep.subr.bf16.mxu1 %v394_v19 }
  0x49   :  { %397 = vmatpush3.bf16.msra.mxu1 %v394_v19 }
  0x4a   :  { %399 = vmatprep.subr.bf16.mxu1 %v398_v22 }
  0x4d   :  { %401 = vmatpush3.bf16.msra.mxu1 %v398_v22 }
  0x4e   :  { %403 = vmatprep.subr.bf16.mxu1 %v402_v25 }
  0x51   :  { %405 = vmatpush3.bf16.msra.mxu1 %v402_v25 }
  0x52   :  { %407 = vmatprep.subr.bf16.mxu1 %v406_v28 }
  0x55   :  { %409 = vmatpush3.bf16.msra.mxu1 %v406_v28 }
  0x56   :  { %411 = vmatprep.subr.bf16.mxu1 %v410_v31 }
  0x59   :  { %413 = vmatpush3.bf16.msra.mxu1 %v410_v31 }
 0x115   :  { %v338_v33 = vpop.f32.mrb[0].mxu0 }
 0x116   :  { %v157_v34 = vadd.f32 %v338_v33, %v300_v32  ;;  %v151_v35 = vpop.f32.mrb[1].mxu0 }
 0x117   :  { %v152_v36 = vadd.f32 %v300_v32, %v151_v35 }
 0x118   :  { %v161_v37 = vmax.f32 %v157_v34, 0.0 }
 0x119   :  { %v160_v38 = vmax.f32 %v152_v36, 0.0 }
 0x11a   :  { %163 = vst [vmem:[#allocation8 + $0x8] sm:$0xff] %v161_v37 }
 0x11b   :  { %162 = vst [vmem:[#allocation8] sm:$0xff] %v160_v38  ;;  %371 = vmatprep.mubr.f32.mxu1 %v160_v38 }
 0x11c   :  { %372 = vmatmul.mubr.f32.vlgmr.msra.gmra.mrb[0].mxu1 %v161_v37 }
 0x11d   :  { %498 = shalt.err (!%p495_p0)
}
 0x11e   :  { %s499_s16 = scalar_lea.hbm %s676_s5, 256 }
 0x11f   :  { %p500_p1 = scmp.ne.s32.totalorder %s676_s5, %s499_s16  ;;  %p503_p2 = scmp.lt.u32.totalorder %s499_s16, %s676_s5 }
 0x121   :  { %p505_p3 = pnand %p503_p2, %p500_p1 }
 0x123   :  { %508 = shalt.err (!%p505_p3)
}
 0x124   :  { %277 = dma.vmem_to_hbm [thread:$0]  %s272_s13, 256, %s676_s5, [#allocation4], %s541_s9, %s541_s9, %s542_s10  }
 0x125   :  { %v303_v39 = vld [vmem:[%s675_s4] ss:$0 sm:$0xff]  ;;  %s545_s25 = smov [#allocation9]  }
 0x126   :  { %s283_s26 = sshll.u32 %s545_s25, 4  ;;  %s284_s26 = int_to_ptr.vmem [resolvable:$true] %s283_s26 }
 0x127   :  { %s509_s27 = scalar_lea.vmem %s284_s26, 256  ;;  %p514_p5 = scmp.lt.s32.totalorder %s284_s26, %s284_s26 }
 0x128   :  { %p510_p4 = scmp.ne.s32.totalorder %s284_s26, %s509_s27  ;;  %p515_p6 = scmp.lt.s32.totalorder %s509_s27, %s509_s27 }
 0x12a   :  { %p516_p7 = por %p515_p6, %p514_p5 }
 0x12c   :  { %p517_p8 = pnand %p516_p7, %p510_p4 }
 0x1ef   :  { %v373_v40 = vpop.f32.mrb[0].mxu1 }
 0x1f0   :  { %v259_v41 = vadd.f32 %v373_v40, %v303_v39  ;;  %v253_v42 = vpop.f32.mrb[1].mxu1 }
 0x1f1   :  { %v254_v43 = vadd.f32 %v303_v39, %v253_v42 }
 0x1f2   :  { %v263_v44 = vmax.f32 %v259_v41, 0.0 }
 0x1f3   :  { %v262_v45 = vmax.f32 %v254_v43, 0.0 }
 0x1f4   :  { %265 = vst [vmem:[#allocation9 + $0x8] sm:$0xff] %v263_v44 }
 0x1f5   :  { %264 = vst [vmem:[#allocation9] sm:$0xff] %v262_v45 }
 0x1f6   :  { %520 = shalt.err (!%p517_p8)
}
 0x1f7   :  { %s521_s28 = scalar_lea.hbm %s677_s6, 256 }
 0x1f8   :  { %p522_p9 = scmp.ne.s32.totalorder %s677_s6, %s521_s28  ;;  %p525_p10 = scmp.lt.u32.totalorder %s521_s28, %s677_s6 }
 0x1fa   :  { %p527_p11 = pnand %p525_p10, %p522_p9 }
 0x1fc   :  { %530 = shalt.err (!%p527_p11)
}
 0x1fd   :  { %289 = dma.vmem_to_hbm [thread:$0]  %s284_s26, 256, %s677_s6, [#allocation10], %s541_s9, %s541_s9, %s542_s10  }
 0x1fe   :  { %535 = dma.done.wait [#allocation4], 256  }
 0x1ff   :  { %536 = vsyncadd [#allocation4], 4294967040 }
 0x200   :  { %537 = dma.done.wait [#allocation10], 256  }
 0x201   :  { %538 = vsyncadd [#allocation10], 4294967040 }
 0x202   :  { %296 = vsyncpa [#allocation3], 1 }
 0x203   :  { %297 = vsyncpa [#allocation6], 1 }
 0x204   :  { %298 = vsyncpa [#allocation4], 1 }
 0x205   :  { %299 = vsyncpa [#allocation10], 1 }

</bundles_post_ra>
